<compile_context>
chip_gen: v7x
topology: tpu7x:2x2x1
jax: 0.10.0
libtpu: 0.0.40
codegen_flags: <defaults>
</compile_context>

<pallas_src>
import math

import jax
import jax.numpy as jnp
from jax.experimental import pallas as pl
from jax.experimental.pallas import tpu as pltpu


# --------------------------------------------------------------------------
# Kernel body: a single VPU elementwise add.  jnp broadcasting covers both
# paths: (s_tile, D) + (s_tile, D) and (B, lane_tile) + (1, lane_tile)
# (the latter is a cheap sublane broadcast).
# --------------------------------------------------------------------------
def _add_pe_kernel(x_ref, pe_ref, out_ref):
    out_ref[...] = x_ref[...] + pe_ref[...]


# --------------------------------------------------------------------------
# pe buffer construction — mirrors the PyTorch __init__ exactly (without the
# leading batch dim).  Pre-cast to the model dtype once here so the forward
# pass never pays a slice+convert pass over HBM.
# --------------------------------------------------------------------------
def make_positional_encoding(max_len, d_model, dtype=jnp.float32):
    assert d_model % 2 == 0, "d_model must be even (sin/cos interleave)"
    position = jnp.arange(max_len, dtype=jnp.float32)[:, None]              # (L, 1)
    div_term = jnp.exp(
        jnp.arange(0, d_model, 2, dtype=jnp.float32)
        * (-math.log(10000.0) / d_model)
    )                                                                        # (D/2,)
    pe = jnp.zeros((max_len, d_model), dtype=jnp.float32)
    pe = pe.at[:, 0::2].set(jnp.sin(position * div_term))
    pe = pe.at[:, 1::2].set(jnp.cos(position * div_term))
    return pe.astype(dtype)


# --------------------------------------------------------------------------
# Tiling helpers.
# --------------------------------------------------------------------------
_SUBLANE_MULTIPLE = {4: 8, 2: 16, 1: 32}   # itemsize -> row multiple


def _default_vmem_limit_bytes():
    """Explicit scoped-VMEM limit: ~3/4 of physical per-core VMEM
    (128 MiB on v5e/v6e, 64 MiB on v7x), capped at 96 MiB so compiler
    scratch / pipelining headroom always remains."""
    phys = 64 << 20  # conservative fallback = v7x per-core VMEM
    try:
        info = pltpu.get_tpu_info()
        phys = int(getattr(info, "vmem_capacity_bytes", phys))
    except Exception:
        pass
    return int(min(phys * 3 // 4, 96 << 20))


def _choose_s_tile(S, D, itemsize, tile_budget_bytes):
    """Largest row tile whose per-step footprint fits the budget.

    Per-step working set = 6 tile-sized buffers: x in x2, pe x2, out x2
    (default double-buffering)."""
    sub = _SUBLANE_MULTIPLE.get(itemsize, 8)
    row_bytes = max(1, D * itemsize)
    max_rows = max(1, tile_budget_bytes // (6 * row_bytes))
    if max_rows >= S:
        return S                       # full dim: always a legal block shape
    if max_rows < sub:
        return min(S, sub)
    return (max_rows // sub) * sub


def _choose_lane_tile(N, B, itemsize, tile_budget_bytes):
    """Largest lane tile (multiple of 128) for the flattened (B, N) path.

    Per-step working set per lane = x (B rows) x2 + out (B rows) x2 + pe x2
    = (4B + 2) * itemsize bytes."""
    per_lane = max(1, (4 * B + 2) * itemsize)
    max_lanes = max(1, tile_budget_bytes // per_lane)
    if max_lanes >= N:
        return N                       # full dim: always a legal block shape
    if max_lanes < 128:
        return min(N, 128)
    return (max_lanes // 128) * 128


# --------------------------------------------------------------------------
# Forward pass.
# --------------------------------------------------------------------------
def positional_encoding_forward(x, pe, *, vmem_limit_bytes=None, donate_x=False):
    """x: (B, S, D); pe: (max_len, D) buffer (pre-cast to x.dtype at init).

    Returns x + pe[None, :S, :] (eval-mode forward of PositionalEncoding)."""
    B, S, D = x.shape
    assert pe.ndim == 2 and pe.shape[1] == D and pe.shape[0] >= S
    if pe.dtype != x.dtype:
        # No-op when pe was built with the model dtype (the intended usage).
        pe = pe.astype(x.dtype)

    itemsize = jnp.dtype(x.dtype).itemsize
    if vmem_limit_bytes is None:
        vmem_limit_bytes = _default_vmem_limit_bytes()
    tile_budget = vmem_limit_bytes // 2   # keep half the limit as headroom

    # Accurate scheduler hint: x read + out write + pe read ONCE.
    cost = pl.CostEstimate(
        flops=B * S * D,
        transcendentals=0,
        bytes_accessed=(2 * B * S * D + S * D) * itemsize,
    )
    io_alias = {0: 0} if donate_x else {}

    if D % 128 == 0:
        # ---- Lane-aligned path: 3-D row tiles, pe resident across batch ----
        s_tile = _choose_s_tile(S, D, itemsize, tile_budget)
        grid = (pl.cdiv(S, s_tile), B)   # batch innermost -> pe not re-DMA'd
        return pl.pallas_call(
            _add_pe_kernel,
            out_shape=jax.ShapeDtypeStruct((B, S, D), x.dtype),
            grid_spec=pl.GridSpec(
                grid=grid,
                in_specs=[
                    # batch squeezed -> kernel sees a lane-dense (s_tile, D) tile
                    pl.BlockSpec((None, s_tile, D), lambda s, b: (b, s, 0)),
                    # full (max_len, D) pe buffer; [:S] expressed by the index
                    # map, block index independent of b -> fetched once per s.
                    pl.BlockSpec((s_tile, D), lambda s, b: (s, 0)),
                ],
                out_specs=pl.BlockSpec((None, s_tile, D), lambda s, b: (b, s, 0)),
            ),
            compiler_params=pltpu.CompilerParams(
                # outer S-tile axis parallel (megacore split), inner batch axis
                # sequential so the pe block stays resident on each core.
                dimension_semantics=("parallel", "arbitrary"),
                vmem_limit_bytes=vmem_limit_bytes,
            ),
            cost_estimate=cost,
            input_output_aliases=io_alias,
        )(x, pe)

    # ---- Lane-flattened path: guarantees lane-dense stores for D < 128 or
    #      D not a multiple of 128.  pe has no batch axis at all, so it is
    #      read exactly once in total.
    N = S * D
    x2 = x.reshape(B, N)                       # contiguous reshape (free)
    pe_flat = pe[:S].reshape(1, N)             # tiny (S*D) contiguous slice
    lane_tile = _choose_lane_tile(N, B, itemsize, tile_budget)
    grid = (pl.cdiv(N, lane_tile),)
    out2 = pl.pallas_call(
        _add_pe_kernel,
        out_shape=jax.ShapeDtypeStruct((B, N), x.dtype),
        grid_spec=pl.GridSpec(
            grid=grid,
            in_specs=[
                pl.BlockSpec((B, lane_tile), lambda l: (0, l)),
                pl.BlockSpec((1, lane_tile), lambda l: (0, l)),
            ],
            out_specs=pl.BlockSpec((B, lane_tile), lambda l: (0, l)),
        ),
        compiler_params=pltpu.CompilerParams(
            dimension_semantics=("parallel",),
            vmem_limit_bytes=vmem_limit_bytes,
        ),
        cost_estimate=cost,
        input_output_aliases=io_alias,
    )(x2, pe_flat)
    return out2.reshape(B, S, D)


def positional_encoding_reference(x, pe):
    """Pure-JAX reference mirroring the PyTorch forward (eval mode)."""
    S = x.shape[1]
    return x + pe[None, :S, :].astype(x.dtype)


if __name__ == "__main__":
    key = jax.random.PRNGKey(0)
    k0, k1 = jax.random.split(key)

    # Primary demo shape: batch=2, seq=8, d_model=32  -> lane-flattened path.
    B, S, D = 2, 8, 32
    x = jax.random.normal(k0, (B, S, D), dtype=jnp.float32)
    pe = make_positional_encoding(max_len=5000, d_model=D, dtype=jnp.float32)
    out = jax.block_until_ready(positional_encoding_forward(x, pe))
    ref = positional_encoding_reference(x, pe)
    assert out.shape == (B, S, D)
    assert jnp.allclose(out, ref, atol=1e-6, rtol=1e-6), "flattened-path mismatch"

    # Lane-aligned shape: d_model=128 -> 3-D row-tiled path with resident pe.
    D2 = 128
    x2 = jax.random.normal(k1, (B, S, D2), dtype=jnp.float32)
    pe2 = make_positional_encoding(max_len=5000, d_model=D2, dtype=jnp.float32)
    out2 = jax.block_until_ready(positional_encoding_forward(x2, pe2))
    ref2 = positional_encoding_reference(x2, pe2)
    assert out2.shape == (B, S, D2)
    assert jnp.allclose(out2, ref2, atol=1e-6, rtol=1e-6), "row-tiled-path mismatch"

    print("KERNEL_OK")
</pallas_src>

<mosaic_0001>
module attributes {stable_mosaic.version = 11 : i64} {
  func.func @_add_pe_kernel(%arg0: i32, %arg1: memref<2x256xf32, #tpu.memory_space<vmem>>, %arg2: memref<1x256xf32, #tpu.memory_space<vmem>>, %arg3: memref<2x256xf32, #tpu.memory_space<vmem>>) attributes {dimension_semantics = [#tpu.dimension_semantics<parallel>], iteration_bounds = array<i64: 1>, scalar_prefetch = 0 : i64, scratch_operands = 0 : i64, tpu.core_type = #tpu.core_type<tc>, window_params = [{transform_indices = @transform_0, window_bounds = array<i64: 2, 256>}, {transform_indices = @transform_1, window_bounds = array<i64: 1, 256>}, {transform_indices = @transform_2, window_bounds = array<i64: 2, 256>}]} {
    %c0 = arith.constant 0 : index
    %c0_0 = arith.constant 0 : index
    %0 = vector.load %arg1[%c0, %c0_0] : memref<2x256xf32, #tpu.memory_space<vmem>>, vector<2x256xf32>
    %c0_1 = arith.constant 0 : index
    %c0_2 = arith.constant 0 : index
    %1 = vector.load %arg2[%c0_1, %c0_2] : memref<1x256xf32, #tpu.memory_space<vmem>>, vector<1x256xf32>
    %2 = vector.broadcast %1 : vector<1x256xf32> to vector<2x256xf32>
    %3 = arith.addf %0, %2 : vector<2x256xf32>
    %c0_3 = arith.constant 0 : index
    %c0_4 = arith.constant 0 : index
    %4 = vector.load %arg3[%c0_3, %c0_4] : memref<2x256xf32, #tpu.memory_space<vmem>>, vector<2x256xf32>
    tpu.vector_store %arg3[%c0_3, %c0_4], %3 {strides = array<i32>} : memref<2x256xf32, #tpu.memory_space<vmem>>, vector<2x256xf32>,
    return
  }
  func.func @transform_0(%arg0: i32) -> (i32, i32) {
    %c0_i32 = arith.constant 0 : i32
    %c0_i32_0 = arith.constant 0 : i32
    return %c0_i32, %arg0 : i32, i32
  }
  func.func @transform_1(%arg0: i32) -> (i32, i32) {
    %c0_i32 = arith.constant 0 : i32
    %c0_i32_0 = arith.constant 0 : i32
    return %c0_i32, %arg0 : i32, i32
  }
  func.func @transform_2(%arg0: i32) -> (i32, i32) {
    %c0_i32 = arith.constant 0 : i32
    %c0_i32_0 = arith.constant 0 : i32
    return %c0_i32, %arg0 : i32, i32
  }
}

</mosaic_0001>

<bundles_post_ra>
// kernel: tpu_custom_call.1
= control target key start
LH: loop header
LB: loop body
LE: loop exit
PB: predicated region body
PF: predicated region fallthrough
CT: control target
= control target key end

     0   :  { %7 = vsyncpa [#allocation3], 0  ;;  %s157_s0 = inlined_call_operand.hbm [shape: f32[2,256], index: 0, kind: input, shape index: {}]   ;;  %s158_s1 = inlined_call_operand.vmem [shape: f32[1,256], index: 1, kind: input, shape index: {}]   ;;  %s159_s2 = inlined_call_operand.hbm [shape: f32[2,256], index: 2, kind: output, shape index: {}]  }
   0x1   :  { %8 = vsyncpa [#allocation4], 0  ;;  %s112_s9 = smov [#allocation2]   ;;  %s64_s13 = scalar_lea.hbm %s157_s0, 64 }
   0x2   :  { %s15_s10 = sshll.u32 %s112_s9, 4  ;;  %p65_p0 = scmp.ne.s32.totalorder %s157_s0, %s64_s13  ;;  %s16_s10 = int_to_ptr.vmem [resolvable:$true] %s15_s10 }
   0x3   :  { %p68_p1 = scmp.lt.u32.totalorder %s64_s13, %s157_s0 }
   0x5   :  { %p70_p2 = pnand %p68_p1, %p65_p0 }
   0x7   :  { %73 = shalt.err (!%p70_p2)
}
   0x8   :  { %s74_s18 = scalar_lea.vmem %s16_s10, 64  ;;  %p79_p4 = scmp.lt.s32.totalorder %s16_s10, %s16_s10 }
   0x9   :  { %p75_p3 = scmp.ne.s32.totalorder %s16_s10, %s74_s18  ;;  %p80_p5 = scmp.lt.s32.totalorder %s74_s18, %s74_s18 }
   0xb   :  { %p81_p6 = por %p80_p5, %p79_p4 }
   0xd   :  { %p82_p7 = pnand %p81_p6, %p75_p3 }
   0xf   :  { %85 = shalt.err (!%p82_p7)
}
  0x10   :  { %18 = dma.hbm_to_vmem [thread:$0]  %s157_s0, 64, %s16_s10, [#allocation3]  }
  0x11   :  { %108 = dma.done.wait [#allocation3], 64  }
  0x12   :  { %109 = vsyncadd [#allocation3], 4294967232  ;;  %v27_v0 = vlaneseq  ;;  %v113_v1 = vmov 1983009808   ;;  %v25_v7 = vld [vmem:[%s158_s1] sm:$0x3] }
  0x13   :  { %v37_v2 = vunpack.c.l.s4 %v113_v1  ;;  %v24_v12 = vld [vmem:[#allocation2] sm:$0xf]  ;;  %s114_s23 = smov [#allocation5]  }
  0x14   :  { %v28_v3 = vshrl.u32 %v27_v0, 7  ;;  %s52_s0 = sshll.u32 %s114_s23, 4  ;;  %s53_s0 = int_to_ptr.vmem [resolvable:$true] %s52_s0 }
  0x15   :  { %v38_v6 = vunpack.c.0.s8 %v37_v2  ;;  %s86_s24 = scalar_lea.vmem %s53_s0, 64  ;;  %p91_p9 = scmp.lt.s32.totalorder %s53_s0, %s53_s0 }
  0x16   :  { %v29_v4 = vsub.s32 0, %v28_v3  ;;  %v33_v5 = vsub.s32 1, %v28_v3  ;;  %p87_p8 = scmp.ne.s32.totalorder %s53_s0, %s86_s24  ;;  %p92_p10 = scmp.lt.s32.totalorder %s86_s24, %s86_s24 }
  0x17   :  { %v41_v10 = vsub.s32 %v38_v6, %v28_v3 }
  0x18   :  { %v30_v8 = vrot.slane %v25_v7, %v29_v4  ;;  %v34_v9 = vrot.slane %v25_v7, %v33_v5  ;;  %p93_p11 = por %p92_p10, %p91_p9 }
  0x1a   :  { %v35_v11 = vcombine.low %v30_v8, %v34_v9  ;;  %p94_p12 = pnand %p93_p11, %p87_p8 }
  0x1c   :  { %v42_v13 = vrot.slane %v35_v11, %v41_v10 }
  0x1e   :  { %v44_v14 = vadd.f32 %v42_v13, %v24_v12 }
  0x20   :  { %45 = vst [vmem:[#allocation5] sm:$0xf] %v44_v14 }
  0x21   :  { %97 = shalt.err (!%p94_p12)
}
  0x22   :  { %s98_s26 = scalar_lea.hbm %s159_s2, 64 }
  0x23   :  { %p99_p13 = scmp.ne.s32.totalorder %s159_s2, %s98_s26  ;;  %p102_p0 = scmp.lt.u32.totalorder %s98_s26, %s159_s2 }
  0x25   :  { %p104_p1 = pnand %p102_p0, %p99_p13 }
  0x27   :  { %107 = shalt.err (!%p104_p1)
}
  0x28   :  { %55 = dma.vmem_to_hbm [thread:$0]  %s53_s0, 64, %s159_s2, [#allocation4]  }
  0x29   :  { %110 = dma.done.wait [#allocation4], 64  }
  0x2a   :  { %111 = vsyncadd [#allocation4], 4294967232 }
  0x2b   :  { %59 = vsyncpa [#allocation3], 1 }
  0x2c   :  { %60 = vsyncpa [#allocation4], 1 }

</bundles_post_ra>
